<compile_context>
chip_gen: v7x
topology: tpu7x:2x2x1
jax: 0.10.0
libtpu: 0.0.40
codegen_flags: <defaults>
</compile_context>

<pallas_src>
import numpy as np
import jax
import jax.numpy as jnp
from jax.experimental import pallas as pl
from jax.experimental.pallas import tpu as pltpu


# ----------------------------------------------------------------- packing --

def _ceil8(n):
    return (n + 7) // 8 * 8


def _pack_slab(named_arrays):
    """Stack 2-D arrays into one (rows, W) f32 slab.

    Each array starts on an 8-aligned sublane row (aligned, unmasked loads)
    and occupies columns [0:ncols).  Returns (slab, {name: (row0, nr, nc)}).
    """
    W = max(int(a.shape[1]) for _, a in named_arrays)
    layout, r = {}, 0
    for name, a in named_arrays:
        nr, nc = int(a.shape[0]), int(a.shape[1])
        layout[name] = (r, nr, nc)
        r += _ceil8(nr)
    slab = np.zeros((max(_ceil8(r), 8), W), np.float32)
    for name, a in named_arrays:
        r0, nr, nc = layout[name]
        slab[r0:r0 + nr, :nc] = np.asarray(a, np.float32)
    return jnp.asarray(slab), layout


# ------------------------------------------------------------------ kernel --

def make_gnn_kernel(data_layout, param_layout, T, hidden1, hidden2):
    """Build the fused forward kernel for a fixed static slab layout.

    Data slab rows:  feat(N,Fin), mask(N,T), neg_dist(N,N), mask_add(N,N),
                     agg_adj(N,N), sel0..sel{T-1} (each (N,N) masked one-hot).
    Param slab rows: lstm{1,2}_{wih,whh,b}, sage{1,2}_{wself,wneigh,b},
                     attn_{w,b,a_dst,a_src} (gates packed (i,f,g,o))."""
    f32 = jnp.float32

    def kernel(data_ref, param_ref, o_ref):
        def D(name):
            r0, nr, nc = data_layout[name]
            return data_ref[r0:r0 + nr, 0:nc]

        def P(name):
            r0, nr, nc = param_layout[name]
            return param_ref[r0:r0 + nr, 0:nc]

        feat = D('feat')            # (N, F_in)
        mask = D('mask')            # (N, T)   1.0 = real neighbour
        neg_dist = D('neg_dist')    # (N, N)   -||p_i - p_j|| (precomputed)
        mask_add = D('mask_add')    # (N, N)   0 on edges/self-loops, -1e30 else
        agg_adj = D('agg_adj')      # (N, N)   row i = in-neighbours of i

        def lstm_agg(x, wih, whh, b, hdim):
            """DGL SAGEConv(aggregator='lstm') neighbour reducer.

            Neighbour gather runs in-kernel as sel[t] @ x (masked one-hot);
            the four gates are fused into single (F,4H)/(H,4H) matmuls.
            T is tiny & static -> fully unrolled.
            TODO(synk): switch to lax.fori_loop(..., unroll=True) and keep the
            input projection inside the loop body if T grows (live ranges)."""
            n = x.shape[0]
            h = jnp.zeros((n, hdim), f32)
            c = jnp.zeros((n, hdim), f32)
            for t in range(T):
                x_t = jnp.dot(D(f'sel{t}'), x, preferred_element_type=f32)
                g = (jnp.dot(x_t, wih, preferred_element_type=f32)
                     + jnp.dot(h, whh, preferred_element_type=f32) + b)
                i_g = jax.nn.sigmoid(g[:, 0 * hdim:1 * hdim])
                f_g = jax.nn.sigmoid(g[:, 1 * hdim:2 * hdim])
                g_g = jnp.tanh(g[:, 2 * hdim:3 * hdim])
                o_g = jax.nn.sigmoid(g[:, 3 * hdim:4 * hdim])
                c_new = f_g * c + i_g * g_g
                h_new = o_g * jnp.tanh(c_new)
                m = mask[:, t:t + 1]            # hold state on padded slots
                h = m * h_new + (1.0 - m) * h
                c = m * c_new + (1.0 - m) * c
            return h

        def sage_relu(h_self, h_neigh, w_s, w_n, b):
            """relu(fc_self(h_self) + fc_neigh(h_neigh)) — SAGEConv + F.relu."""
            return jnp.maximum(
                jnp.dot(h_self, w_s, preferred_element_type=f32)
                + jnp.dot(h_neigh, w_n, preferred_element_type=f32) + b, 0.0)

        # ---- conv1 = SAGEConv(in_feats, h_feats, 'lstm'), then F.relu ----
        hn = lstm_agg(feat, P('lstm1_wih'), P('lstm1_whh'), P('lstm1_b'),
                      hidden1)
        h = sage_relu(feat, hn, P('sage1_wself'), P('sage1_wneigh'),
                      P('sage1_b'))

        # ---- spatial_attention(h, pos, edge_index) ----
        # TODO(synk): GraphSpatialAttentionNetwork is not defined in the source
        # file; this is a documented GAT-style, distance-biased approximation.
        wh = jnp.dot(h, P('attn_w'), preferred_element_type=f32) + P('attn_b')
        dn = (((1,), (1,)), ((), ()))            # contract last dims
        s_dst = jax.lax.dot_general(wh, P('attn_a_dst'), dn,
                                    preferred_element_type=f32)   # (N, 1)
        s_src = jax.lax.dot_general(P('attn_a_src'), wh, dn,
                                    preferred_element_type=f32)   # (1, N)
        e = s_dst + s_src + neg_dist
        e = jnp.where(e > 0, e, 0.2 * e)         # LeakyReLU(0.2)
        e = e + mask_add                         # additive -1e30 adjacency mask
        e = e - jnp.max(e, axis=-1, keepdims=True)
        p = jnp.exp(e)                           # masked entries underflow to 0
        alpha = p * pl.reciprocal(jnp.sum(p, axis=-1, keepdims=True) + 1e-9,
                                  approx=True)
        h = jnp.dot(alpha, wh, preferred_element_type=f32)

        # ---- conv2 = SAGEConv(h_feats, num_class, 'lstm'), then F.relu ----
        hn = lstm_agg(h, P('lstm2_wih'), P('lstm2_whh'), P('lstm2_b'), hidden2)
        h = sage_relu(h, hn, P('sage2_wself'), P('sage2_wneigh'), P('sage2_b'))

        # ---- update_all(copy_u('h','m'), sum('m','h')) as dense A @ H ----
        # (eweight=None path; with eweight the adjacency would hold edge weights.)
        o_ref[...] = jnp.dot(agg_adj, h, preferred_element_type=f32)

    return kernel


# ----------------------------------------------------------------- wrapper --

def gnn_forward(feat, pos, sel, nbr_mask, attn_adj, agg_adj, params):
    """Pack operands into two f32 slabs and run the fused kernel (no grid)."""
    feat = np.asarray(feat, np.float32)
    pos = np.asarray(pos, np.float32)
    sel = np.asarray(sel, np.float32)
    nbr_mask = np.asarray(nbr_mask, np.float32)
    attn_adj = np.asarray(attn_adj, np.float32)
    agg_adj = np.asarray(agg_adj, np.float32)

    N, in_feats = feat.shape
    T = sel.shape[0]
    h_feats = int(params['attn_w'].shape[0])
    num_class = int(params['sage2_wself'].shape[1])

    # Static per-graph geometry hoisted out of the kernel:
    #   neg_dist = -||p_i - p_j||,  mask_add = 0 on adjacency(+self), else -1e30
    sq = np.sum(pos * pos, axis=-1, keepdims=True)
    dist = np.sqrt(np.maximum(sq + sq.T - 2.0 * (pos @ pos.T), 0.0))
    neg_dist = (-dist).astype(np.float32)
    mask_add = np.where(attn_adj > 0, 0.0, -1e30).astype(np.float32)

    data_entries = [('feat', feat), ('mask', nbr_mask),
                    ('neg_dist', neg_dist), ('mask_add', mask_add),
                    ('agg_adj', agg_adj)]
    data_entries += [(f'sel{t}', sel[t]) for t in range(T)]
    data_slab, data_layout = _pack_slab(data_entries)

    param_names = ['lstm1_wih', 'lstm1_whh', 'lstm1_b',
                   'sage1_wself', 'sage1_wneigh', 'sage1_b',
                   'attn_w', 'attn_b', 'attn_a_dst', 'attn_a_src',
                   'lstm2_wih', 'lstm2_whh', 'lstm2_b',
                   'sage2_wself', 'sage2_wneigh', 'sage2_b']
    param_slab, param_layout = _pack_slab([(k, params[k]) for k in param_names])

    kernel = make_gnn_kernel(data_layout, param_layout, T,
                             hidden1=in_feats, hidden2=h_feats)

    return pl.pallas_call(
        kernel,
        out_shape=jax.ShapeDtypeStruct((N, num_class), jnp.float32),
        in_specs=[pl.BlockSpec(memory_space=pltpu.MemorySpace.VMEM),
                  pl.BlockSpec(memory_space=pltpu.MemorySpace.VMEM)],
        out_specs=pl.BlockSpec(memory_space=pltpu.MemorySpace.VMEM),
    )(data_slab, param_slab)


# --------------------------------------------------------------------- main --

if __name__ == "__main__":
    key = jax.random.PRNGKey(0)
    N, in_feats, h_feats, num_class = 8, 4, 8, 3

    # deterministic edge list (src, dst); stands in for the file-loaded
    # `edge_index = torch.tensor(edge_index).t()`
    edges = np.array([(0, 1), (1, 2), (2, 3), (3, 4), (4, 5), (5, 6), (6, 7),
                      (7, 0), (0, 2), (1, 3), (2, 5), (4, 7), (6, 1), (5, 0)],
                     dtype=np.int32)

    # padded in-neighbour lists -> masked one-hot selection matrices so the
    # gather runs in-kernel (sel[t] @ X == X[nbr_idx[:, t]] * nbr_mask[:, t, None])
    in_nbrs = [[int(s) for s, d in edges if d == i] for i in range(N)]
    T = max(len(nb) for nb in in_nbrs)
    nbr_mask = np.zeros((N, T), np.float32)
    sel = np.zeros((T, N, N), np.float32)
    for i, nb in enumerate(in_nbrs):
        for t, j in enumerate(nb):
            nbr_mask[i, t] = 1.0
            sel[t, i, j] = 1.0

    # dense adjacencies: row i holds sources j of edges j -> i
    agg_adj = np.zeros((N, N), np.float32)
    for s, d in edges:
        agg_adj[d, s] = 1.0                          # copy_u + sum
    attn_adj = agg_adj.copy()
    attn_adj[np.arange(N), np.arange(N)] = 1.0       # self-loops for attention

    keys = iter(jax.random.split(key, 32))

    def rnd(shape, scale=0.1):
        return (scale * jax.random.normal(next(keys), shape)).astype(jnp.float32)

    feat = rnd((N, in_feats), 1.0)
    pos = rnd((N, 2), 1.0)   # replaces FeatureToPoint.xlsx longitude/latitude

    params = {
        # SAGEConv 1 (in_feats -> h_feats, 'lstm'): LSTM hidden size = in_feats.
        # Gate weights packed (i, f, g, o) along the last axis.
        'lstm1_wih': rnd((in_feats, 4 * in_feats)),
        'lstm1_whh': rnd((in_feats, 4 * in_feats)),
        'lstm1_b':   rnd((1, 4 * in_feats)),
        'sage1_wself':  rnd((in_feats, h_feats)),
        'sage1_wneigh': rnd((in_feats, h_feats)),
        'sage1_b':      rnd((1, h_feats)),
        # GraphSpatialAttentionNetwork(h_feats, h_feats) — approximated
        'attn_w':     rnd((h_feats, h_feats)),
        'attn_b':     rnd((1, h_feats)),
        'attn_a_dst': rnd((1, h_feats)),
        'attn_a_src': rnd((1, h_feats)),
        # SAGEConv 2 (h_feats -> num_class, 'lstm'): LSTM hidden size = h_feats
        'lstm2_wih': rnd((h_feats, 4 * h_feats)),
        'lstm2_whh': rnd((h_feats, 4 * h_feats)),
        'lstm2_b':   rnd((1, 4 * h_feats)),
        'sage2_wself':  rnd((h_feats, num_class)),
        'sage2_wneigh': rnd((h_feats, num_class)),
        'sage2_b':      rnd((1, num_class)),
        # nn.BatchNorm1d(h_feats) is constructed in __init__ but never used in
        # forward(), so it is intentionally omitted.
    }

    out = gnn_forward(feat, pos, sel, nbr_mask, attn_adj, agg_adj, params)
    out = jax.block_until_ready(out)
    assert out.shape == (N, num_class) and out.dtype == jnp.float32
    assert bool(jnp.all(jnp.isfinite(out)))
    print("KERNEL_OK")
</pallas_src>

<mosaic_0001>
module attributes {stable_mosaic.version = 11 : i64} {
  func.func @kernel(%arg0: memref<56x8xf32, #tpu.memory_space<vmem>>, %arg1: memref<128x32xf32, #tpu.memory_space<vmem>>, %arg2: memref<8x3xf32, #tpu.memory_space<vmem>>) attributes {dimension_semantics = [], scalar_prefetch = 0 : i64, scratch_operands = 0 : i64, tpu.core_type = #tpu.core_type<tc>} {
    %c0 = arith.constant 0 : index
    %c0_0 = arith.constant 0 : index
    %0 = vector.load %arg0[%c0, %c0_0] : memref<56x8xf32, #tpu.memory_space<vmem>>, vector<8x4xf32>
    %c8 = arith.constant 8 : index
    %c0_1 = arith.constant 0 : index
    %1 = vector.load %arg0[%c8, %c0_1] : memref<56x8xf32, #tpu.memory_space<vmem>>, vector<8x2xf32>
    %c16 = arith.constant 16 : index
    %c0_2 = arith.constant 0 : index
    %2 = vector.load %arg0[%c16, %c0_2] : memref<56x8xf32, #tpu.memory_space<vmem>>, vector<8x8xf32>
    %c24 = arith.constant 24 : index
    %c0_3 = arith.constant 0 : index
    %3 = vector.load %arg0[%c24, %c0_3] : memref<56x8xf32, #tpu.memory_space<vmem>>, vector<8x8xf32>
    %c32 = arith.constant 32 : index
    %c0_4 = arith.constant 0 : index
    %4 = vector.load %arg0[%c32, %c0_4] : memref<56x8xf32, #tpu.memory_space<vmem>>, vector<8x8xf32>
    %c0_5 = arith.constant 0 : index
    %c0_6 = arith.constant 0 : index
    %5 = vector.load %arg1[%c0_5, %c0_6] : memref<128x32xf32, #tpu.memory_space<vmem>>, vector<4x16xf32>
    %c8_7 = arith.constant 8 : index
    %c0_8 = arith.constant 0 : index
    %6 = vector.load %arg1[%c8_7, %c0_8] : memref<128x32xf32, #tpu.memory_space<vmem>>, vector<4x16xf32>
    %c16_9 = arith.constant 16 : index
    %c0_10 = arith.constant 0 : index
    %7 = vector.load %arg1[%c16_9, %c0_10] : memref<128x32xf32, #tpu.memory_space<vmem>>, vector<1x16xf32>
    %cst = arith.constant 0.000000e+00 : f32
    %8 = vector.broadcast %cst : f32 to vector<8x4xf32>
    %cst_11 = arith.constant 0.000000e+00 : f32
    %9 = vector.broadcast %cst_11 : f32 to vector<8x4xf32>
    %c40 = arith.constant 40 : index
    %c0_12 = arith.constant 0 : index
    %10 = vector.load %arg0[%c40, %c0_12] : memref<56x8xf32, #tpu.memory_space<vmem>>, vector<8x8xf32>
    %cst_13 = arith.constant dense<0.000000e+00> : vector<8x4xf32>
    %11 = tpu.matmul %10, %0, %cst_13 {dimension_numbers = #tpu.dot_dimension_numbers<[1], [0], [0], [1], [0, 0, 1, 1], [], []>} : vector<8x8xf32>, vector<8x4xf32>, vector<8x4xf32> -> vector<8x4xf32>
    %cst_14 = arith.constant dense<0.000000e+00> : vector<8x16xf32>
    %12 = tpu.matmul %11, %5, %cst_14 {dimension_numbers = #tpu.dot_dimension_numbers<[1], [0], [0], [1], [0, 0, 1, 1], [], []>} : vector<8x4xf32>, vector<4x16xf32>, vector<8x16xf32> -> vector<8x16xf32>
    %cst_15 = arith.constant dense<0.000000e+00> : vector<8x16xf32>
    %13 = tpu.matmul %8, %6, %cst_15 {dimension_numbers = #tpu.dot_dimension_numbers<[1], [0], [0], [1], [0, 0, 1, 1], [], []>} : vector<8x4xf32>, vector<4x16xf32>, vector<8x16xf32> -> vector<8x16xf32>
    %14 = arith.addf %12, %13 : vector<8x16xf32>
    %15 = vector.broadcast %7 : vector<1x16xf32> to vector<8x16xf32>
    %16 = arith.addf %14, %15 : vector<8x16xf32>
    %17 = vector.extract_strided_slice %16 {offsets = [0, 0], sizes = [8, 4], strides = [1, 1]} : vector<8x16xf32> to vector<8x4xf32>
    %18 = arith.negf %17 : vector<8x4xf32>
    %19 = math.exp %18 : vector<8x4xf32>
    %cst_16 = arith.constant 1.000000e+00 : f32
    %20 = vector.broadcast %cst_16 : f32 to vector<8x4xf32>
    %21 = arith.addf %20, %19 : vector<8x4xf32>
    %22 = arith.divf %20, %21 : vector<8x4xf32>
    %23 = vector.extract_strided_slice %16 {offsets = [0, 4], sizes = [8, 4], strides = [1, 1]} : vector<8x16xf32> to vector<8x4xf32>
    %24 = arith.negf %23 : vector<8x4xf32>
    %25 = math.exp %24 : vector<8x4xf32>
    %cst_17 = arith.constant 1.000000e+00 : f32
    %26 = vector.broadcast %cst_17 : f32 to vector<8x4xf32>
    %27 = arith.addf %26, %25 : vector<8x4xf32>
    %28 = arith.divf %26, %27 : vector<8x4xf32>
    %29 = vector.extract_strided_slice %16 {offsets = [0, 8], sizes = [8, 4], strides = [1, 1]} : vector<8x16xf32> to vector<8x4xf32>
    %30 = math.tanh %29 : vector<8x4xf32>
    %31 = vector.extract_strided_slice %16 {offsets = [0, 12], sizes = [8, 4], strides = [1, 1]} : vector<8x16xf32> to vector<8x4xf32>
    %32 = arith.negf %31 : vector<8x4xf32>
    %33 = math.exp %32 : vector<8x4xf32>
    %cst_18 = arith.constant 1.000000e+00 : f32
    %34 = vector.broadcast %cst_18 : f32 to vector<8x4xf32>
    %35 = arith.addf %34, %33 : vector<8x4xf32>
    %36 = arith.divf %34, %35 : vector<8x4xf32>
    %37 = arith.mulf %28, %9 : vector<8x4xf32>
    %38 = arith.mulf %22, %30 : vector<8x4xf32>
    %39 = arith.addf %37, %38 : vector<8x4xf32>
    %40 = math.tanh %39 : vector<8x4xf32>
    %41 = arith.mulf %36, %40 : vector<8x4xf32>
    %42 = vector.extract_strided_slice %1 {offsets = [0, 0], sizes = [8, 1], strides = [1, 1]} : vector<8x2xf32> to vector<8x1xf32>
    %43 = vector.broadcast %42 : vector<8x1xf32> to vector<8x4xf32>
    %44 = arith.mulf %43, %41 : vector<8x4xf32>
    %cst_19 = arith.constant 1.000000e+00 : f32
    %45 = vector.broadcast %cst_19 : f32 to vector<8x1xf32>
    %46 = arith.subf %45, %42 : vector<8x1xf32>
    %47 = vector.broadcast %46 : vector<8x1xf32> to vector<8x4xf32>
    %48 = arith.mulf %47, %8 : vector<8x4xf32>
    %49 = arith.addf %44, %48 : vector<8x4xf32>
    %50 = vector.broadcast %42 : vector<8x1xf32> to vector<8x4xf32>
    %51 = arith.mulf %50, %39 : vector<8x4xf32>
    %cst_20 = arith.constant 1.000000e+00 : f32
    %52 = vector.broadcast %cst_20 : f32 to vector<8x1xf32>
    %53 = arith.subf %52, %42 : vector<8x1xf32>
    %54 = vector.broadcast %53 : vector<8x1xf32> to vector<8x4xf32>
    %55 = arith.mulf %54, %9 : vector<8x4xf32>
    %56 = arith.addf %51, %55 : vector<8x4xf32>
    %c48 = arith.constant 48 : index
    %c0_21 = arith.constant 0 : index
    %57 = vector.load %arg0[%c48, %c0_21] : memref<56x8xf32, #tpu.memory_space<vmem>>, vector<8x8xf32>
    %cst_22 = arith.constant dense<0.000000e+00> : vector<8x4xf32>
    %58 = tpu.matmul %57, %0, %cst_22 {dimension_numbers = #tpu.dot_dimension_numbers<[1], [0], [0], [1], [0, 0, 1, 1], [], []>} : vector<8x8xf32>, vector<8x4xf32>, vector<8x4xf32> -> vector<8x4xf32>
    %cst_23 = arith.constant dense<0.000000e+00> : vector<8x16xf32>
    %59 = tpu.matmul %58, %5, %cst_23 {dimension_numbers = #tpu.dot_dimension_numbers<[1], [0], [0], [1], [0, 0, 1, 1], [], []>} : vector<8x4xf32>, vector<4x16xf32>, vector<8x16xf32> -> vector<8x16xf32>
    %cst_24 = arith.constant dense<0.000000e+00> : vector<8x16xf32>
    %60 = tpu.matmul %49, %6, %cst_24 {dimension_numbers = #tpu.dot_dimension_numbers<[1], [0], [0], [1], [0, 0, 1, 1], [], []>} : vector<8x4xf32>, vector<4x16xf32>, vector<8x16xf32> -> vector<8x16xf32>
    %61 = arith.addf %59, %60 : vector<8x16xf32>
    %62 = vector.broadcast %7 : vector<1x16xf32> to vector<8x16xf32>
    %63 = arith.addf %61, %62 : vector<8x16xf32>
    %64 = vector.extract_strided_slice %63 {offsets = [0, 0], sizes = [8, 4], strides = [1, 1]} : vector<8x16xf32> to vector<8x4xf32>
    %65 = arith.negf %64 : vector<8x4xf32>
    %66 = math.exp %65 : vector<8x4xf32>
    %cst_25 = arith.constant 1.000000e+00 : f32
    %67 = vector.broadcast %cst_25 : f32 to vector<8x4xf32>
    %68 = arith.addf %67, %66 : vector<8x4xf32>
    %69 = arith.divf %67, %68 : vector<8x4xf32>
    %70 = vector.extract_strided_slice %63 {offsets = [0, 4], sizes = [8, 4], strides = [1, 1]} : vector<8x16xf32> to vector<8x4xf32>
    %71 = arith.negf %70 : vector<8x4xf32>
    %72 = math.exp %71 : vector<8x4xf32>
    %cst_26 = arith.constant 1.000000e+00 : f32
    %73 = vector.broadcast %cst_26 : f32 to vector<8x4xf32>
    %74 = arith.addf %73, %72 : vector<8x4xf32>
    %75 = arith.divf %73, %74 : vector<8x4xf32>
    %76 = vector.extract_strided_slice %63 {offsets = [0, 8], sizes = [8, 4], strides = [1, 1]} : vector<8x16xf32> to vector<8x4xf32>
    %77 = math.tanh %76 : vector<8x4xf32>
    %78 = vector.extract_strided_slice %63 {offsets = [0, 12], sizes = [8, 4], strides = [1, 1]} : vector<8x16xf32> to vector<8x4xf32>
    %79 = arith.negf %78 : vector<8x4xf32>
    %80 = math.exp %79 : vector<8x4xf32>
    %cst_27 = arith.constant 1.000000e+00 : f32
    %81 = vector.broadcast %cst_27 : f32 to vector<8x4xf32>
    %82 = arith.addf %81, %80 : vector<8x4xf32>
    %83 = arith.divf %81, %82 : vector<8x4xf32>
    %84 = arith.mulf %75, %56 : vector<8x4xf32>
    %85 = arith.mulf %69, %77 : vector<8x4xf32>
    %86 = arith.addf %84, %85 : vector<8x4xf32>
    %87 = math.tanh %86 : vector<8x4xf32>
    %88 = arith.mulf %83, %87 : vector<8x4xf32>
    %89 = vector.extract_strided_slice %1 {offsets = [0, 1], sizes = [8, 1], strides = [1, 1]} : vector<8x2xf32> to vector<8x1xf32>
    %90 = vector.broadcast %89 : vector<8x1xf32> to vector<8x4xf32>
    %91 = arith.mulf %90, %88 : vector<8x4xf32>
    %cst_28 = arith.constant 1.000000e+00 : f32
    %92 = vector.broadcast %cst_28 : f32 to vector<8x1xf32>
    %93 = arith.subf %92, %89 : vector<8x1xf32>
    %94 = vector.broadcast %93 : vector<8x1xf32> to vector<8x4xf32>
    %95 = arith.mulf %94, %49 : vector<8x4xf32>
    %96 = arith.addf %91, %95 : vector<8x4xf32>
    %c24_29 = arith.constant 24 : index
    %c0_30 = arith.constant 0 : index
    %97 = vector.load %arg1[%c24_29, %c0_30] : memref<128x32xf32, #tpu.memory_space<vmem>>, vector<4x8xf32>
    %c32_31 = arith.constant 32 : index
    %c0_32 = arith.constant 0 : index
    %98 = vector.load %arg1[%c32_31, %c0_32] : memref<128x32xf32, #tpu.memory_space<vmem>>, vector<4x8xf32>
    %c40_33 = arith.constant 40 : index
    %c0_34 = arith.constant 0 : index
    %99 = vector.load %arg1[%c40_33, %c0_34] : memref<128x32xf32, #tpu.memory_space<vmem>>, vector<1x8xf32>
    %cst_35 = arith.constant dense<0.000000e+00> : vector<8x8xf32>
    %100 = tpu.matmul %0, %97, %cst_35 {dimension_numbers = #tpu.dot_dimension_numbers<[1], [0], [0], [1], [0, 0, 1, 1], [], []>} : vector<8x4xf32>, vector<4x8xf32>, vector<8x8xf32> -> vector<8x8xf32>
    %cst_36 = arith.constant dense<0.000000e+00> : vector<8x8xf32>
    %101 = tpu.matmul %96, %98, %cst_36 {dimension_numbers = #tpu.dot_dimension_numbers<[1], [0], [0], [1], [0, 0, 1, 1], [], []>} : vector<8x4xf32>, vector<4x8xf32>, vector<8x8xf32> -> vector<8x8xf32>
    %102 = arith.addf %100, %101 : vector<8x8xf32>
    %103 = vector.broadcast %99 : vector<1x8xf32> to vector<8x8xf32>
    %104 = arith.addf %102, %103 : vector<8x8xf32>
    %cst_37 = arith.constant 0.000000e+00 : f32
    %105 = vector.broadcast %cst_37 : f32 to vector<8x8xf32>
    %106 = arith.maximumf %104, %105 : vector<8x8xf32>
    %c48_38 = arith.constant 48 : index
    %c0_39 = arith.constant 0 : index
    %107 = vector.load %arg1[%c48_38, %c0_39] : memref<128x32xf32, #tpu.memory_space<vmem>>, vector<8x8xf32>
    %cst_40 = arith.constant dense<0.000000e+00> : vector<8x8xf32>
    %108 = tpu.matmul %106, %107, %cst_40 {dimension_numbers = #tpu.dot_dimension_numbers<[1], [0], [0], [1], [0, 0, 1, 1], [], []>} : vector<8x8xf32>, vector<8x8xf32>, vector<8x8xf32> -> vector<8x8xf32>
    %c56 = arith.constant 56 : index
    %c0_41 = arith.constant 0 : index
    %109 = vector.load %arg1[%c56, %c0_41] : memref<128x32xf32, #tpu.memory_space<vmem>>, vector<1x8xf32>
    %110 = vector.broadcast %109 : vector<1x8xf32> to vector<8x8xf32>
    %111 = arith.addf %108, %110 : vector<8x8xf32>
    %c64 = arith.constant 64 : index
    %c0_42 = arith.constant 0 : index
    %112 = vector.load %arg1[%c64, %c0_42] : memref<128x32xf32, #tpu.memory_space<vmem>>, vector<1x8xf32>
    %cst_43 = arith.constant dense<0.000000e+00> : vector<8x1xf32>
    %113 = tpu.matmul %111, %112, %cst_43 {dimension_numbers = #tpu.dot_dimension_numbers<[1], [1], [0], [0], [0, 0, 1, 0], [], []>} : vector<8x8xf32>, vector<1x8xf32>, vector<8x1xf32> -> vector<8x1xf32>
    %c72 = arith.constant 72 : index
    %c0_44 = arith.constant 0 : index
    %114 = vector.load %arg1[%c72, %c0_44] : memref<128x32xf32, #tpu.memory_space<vmem>>, vector<1x8xf32>
    %cst_45 = arith.constant dense<0.000000e+00> : vector<1x8xf32>
    %115 = tpu.matmul %114, %111, %cst_45 {dimension_numbers = #tpu.dot_dimension_numbers<[1], [1], [0], [0], [0, 0, 1, 0], [], []>} : vector<1x8xf32>, vector<8x8xf32>, vector<1x8xf32> -> vector<1x8xf32>
    %116 = vector.broadcast %113 : vector<8x1xf32> to vector<8x8xf32>
    %117 = vector.broadcast %115 : vector<1x8xf32> to vector<8x8xf32>
    %118 = arith.addf %116, %117 : vector<8x8xf32>
    %119 = arith.addf %118, %2 : vector<8x8xf32>
    %cst_46 = arith.constant 0.000000e+00 : f32
    %120 = vector.broadcast %cst_46 : f32 to vector<8x8xf32>
    %121 = arith.cmpf ogt, %119, %120 : vector<8x8xf32>
    %cst_47 = arith.constant 2.000000e-01 : f32
    %122 = vector.broadcast %cst_47 : f32 to vector<8x8xf32>
    %123 = arith.mulf %122, %119 : vector<8x8xf32>
    %124 = arith.select %121, %119, %123 : vector<8x8xi1>, vector<8x8xf32>
    %125 = arith.addf %124, %3 : vector<8x8xf32>
    %cst_48 = arith.constant dense<0xFF800000> : vector<8xf32>
    %126 = vector.multi_reduction <maximumf>, %125, %cst_48 [1] : vector<8x8xf32> to vector<8xf32>
    %127 = vector.shape_cast %126 : vector<8xf32> to vector<8x1xf32>
    %128 = vector.broadcast %127 : vector<8x1xf32> to vector<8x8xf32>
    %129 = arith.subf %125, %128 : vector<8x8xf32>
    %130 = math.exp %129 : vector<8x8xf32>
    %cst_49 = arith.constant dense<0.000000e+00> : vector<8xf32>
    %131 = vector.multi_reduction <add>, %130, %cst_49 [1] : vector<8x8xf32> to vector<8xf32>
    %132 = vector.shape_cast %131 : vector<8xf32> to vector<8x1xf32>
    %cst_50 = arith.constant 9.99999971E-10 : f32
    %133 = vector.broadcast %cst_50 : f32 to vector<8x1xf32>
    %134 = arith.addf %132, %133 : vector<8x1xf32>
    %135 = tpu.reciprocal %134 {approx = true} : vector<8x1xf32> -> vector<8x1xf32>
    %136 = vector.broadcast %135 : vector<8x1xf32> to vector<8x8xf32>
    %137 = arith.mulf %130, %136 : vector<8x8xf32>
    %cst_51 = arith.constant dense<0.000000e+00> : vector<8x8xf32>
    %138 = tpu.matmul %137, %111, %cst_51 {dimension_numbers = #tpu.dot_dimension_numbers<[1], [0], [0], [1], [0, 0, 1, 1], [], []>} : vector<8x8xf32>, vector<8x8xf32>, vector<8x8xf32> -> vector<8x8xf32>
    %c80 = arith.constant 80 : index
    %c0_52 = arith.constant 0 : index
    %139 = vector.load %arg1[%c80, %c0_52] : memref<128x32xf32, #tpu.memory_space<vmem>>, vector<8x32xf32>
    %c88 = arith.constant 88 : index
    %c0_53 = arith.constant 0 : index
    %140 = vector.load %arg1[%c88, %c0_53] : memref<128x32xf32, #tpu.memory_space<vmem>>, vector<8x32xf32>
    %c96 = arith.constant 96 : index
    %c0_54 = arith.constant 0 : index
    %141 = vector.load %arg1[%c96, %c0_54] : memref<128x32xf32, #tpu.memory_space<vmem>>, vector<1x32xf32>
    %cst_55 = arith.constant 0.000000e+00 : f32
    %142 = vector.broadcast %cst_55 : f32 to vector<8x8xf32>
    %cst_56 = arith.constant 0.000000e+00 : f32
    %143 = vector.broadcast %cst_56 : f32 to vector<8x8xf32>
    %c40_57 = arith.constant 40 : index
    %c0_58 = arith.constant 0 : index
    %144 = vector.load %arg0[%c40_57, %c0_58] : memref<56x8xf32, #tpu.memory_space<vmem>>, vector<8x8xf32>
    %cst_59 = arith.constant dense<0.000000e+00> : vector<8x8xf32>
    %145 = tpu.matmul %144, %138, %cst_59 {dimension_numbers = #tpu.dot_dimension_numbers<[1], [0], [0], [1], [0, 0, 1, 1], [], []>} : vector<8x8xf32>, vector<8x8xf32>, vector<8x8xf32> -> vector<8x8xf32>
    %cst_60 = arith.constant dense<0.000000e+00> : vector<8x32xf32>
    %146 = tpu.matmul %145, %139, %cst_60 {dimension_numbers = #tpu.dot_dimension_numbers<[1], [0], [0], [1], [0, 0, 1, 1], [], []>} : vector<8x8xf32>, vector<8x32xf32>, vector<8x32xf32> -> vector<8x32xf32>
    %cst_61 = arith.constant dense<0.000000e+00> : vector<8x32xf32>
    %147 = tpu.matmul %142, %140, %cst_61 {dimension_numbers = #tpu.dot_dimension_numbers<[1], [0], [0], [1], [0, 0, 1, 1], [], []>} : vector<8x8xf32>, vector<8x32xf32>, vector<8x32xf32> -> vector<8x32xf32>
    %148 = arith.addf %146, %147 : vector<8x32xf32>
    %149 = vector.broadcast %141 : vector<1x32xf32> to vector<8x32xf32>
    %150 = arith.addf %148, %149 : vector<8x32xf32>
    %151 = vector.extract_strided_slice %150 {offsets = [0, 0], sizes = [8, 8], strides = [1, 1]} : vector<8x32xf32> to vector<8x8xf32>
    %152 = arith.negf %151 : vector<8x8xf32>
    %153 = math.exp %152 : vector<8x8xf32>
    %cst_62 = arith.constant 1.000000e+00 : f32
    %154 = vector.broadcast %cst_62 : f32 to vector<8x8xf32>
    %155 = arith.addf %154, %153 : vector<8x8xf32>
    %156 = arith.divf %154, %155 : vector<8x8xf32>
    %157 = vector.extract_strided_slice %150 {offsets = [0, 8], sizes = [8, 8], strides = [1, 1]} : vector<8x32xf32> to vector<8x8xf32>
    %158 = arith.negf %157 : vector<8x8xf32>
    %159 = math.exp %158 : vector<8x8xf32>
    %cst_63 = arith.constant 1.000000e+00 : f32
    %160 = vector.broadcast %cst_63 : f32 to vector<8x8xf32>
    %161 = arith.addf %160, %159 : vector<8x8xf32>
    %162 = arith.divf %160, %161 : vector<8x8xf32>
    %163 = vector.extract_strided_slice %150 {offsets = [0, 16], sizes = [8, 8], strides = [1, 1]} : vector<8x32xf32> to vector<8x8xf32>
    %164 = math.tanh %163 : vector<8x8xf32>
    %165 = vector.extract_strided_slice %150 {offsets = [0, 24], sizes = [8, 8], strides = [1, 1]} : vector<8x32xf32> to vector<8x8xf32>
    %166 = arith.negf %165 : vector<8x8xf32>
    %167 = math.exp %166 : vector<8x8xf32>
    %cst_64 = arith.constant 1.000000e+00 : f32
    %168 = vector.broadcast %cst_64 : f32 to vector<8x8xf32>
    %169 = arith.addf %168, %167 : vector<8x8xf32>
    %170 = arith.divf %168, %169 : vector<8x8xf32>
    %171 = arith.mulf %162, %143 : vector<8x8xf32>
    %172 = arith.mulf %156, %164 : vector<8x8xf32>
    %173 = arith.addf %171, %172 : vector<8x8xf32>
    %174 = math.tanh %173 : vector<8x8xf32>
    %175 = arith.mulf %170, %174 : vector<8x8xf32>
    %176 = vector.extract_strided_slice %1 {offsets = [0, 0], sizes = [8, 1], strides = [1, 1]} : vector<8x2xf32> to vector<8x1xf32>
    %177 = vector.broadcast %176 : vector<8x1xf32> to vector<8x8xf32>
    %178 = arith.mulf %177, %175 : vector<8x8xf32>
    %cst_65 = arith.constant 1.000000e+00 : f32
    %179 = vector.broadcast %cst_65 : f32 to vector<8x1xf32>
    %180 = arith.subf %179, %176 : vector<8x1xf32>
    %181 = vector.broadcast %180 : vector<8x1xf32> to vector<8x8xf32>
    %182 = arith.mulf %181, %142 : vector<8x8xf32>
    %183 = arith.addf %178, %182 : vector<8x8xf32>
    %184 = vector.broadcast %176 : vector<8x1xf32> to vector<8x8xf32>
    %185 = arith.mulf %184, %173 : vector<8x8xf32>
    %cst_66 = arith.constant 1.000000e+00 : f32
    %186 = vector.broadcast %cst_66 : f32 to vector<8x1xf32>
    %187 = arith.subf %186, %176 : vector<8x1xf32>
    %188 = vector.broadcast %187 : vector<8x1xf32> to vector<8x8xf32>
    %189 = arith.mulf %188, %143 : vector<8x8xf32>
    %190 = arith.addf %185, %189 : vector<8x8xf32>
    %c48_67 = arith.constant 48 : index
    %c0_68 = arith.constant 0 : index
    %191 = vector.load %arg0[%c48_67, %c0_68] : memref<56x8xf32, #tpu.memory_space<vmem>>, vector<8x8xf32>
    %cst_69 = arith.constant dense<0.000000e+00> : vector<8x8xf32>
    %192 = tpu.matmul %191, %138, %cst_69 {dimension_numbers = #tpu.dot_dimension_numbers<[1], [0], [0], [1], [0, 0, 1, 1], [], []>} : vector<8x8xf32>, vector<8x8xf32>, vector<8x8xf32> -> vector<8x8xf32>
    %cst_70 = arith.constant dense<0.000000e+00> : vector<8x32xf32>
    %193 = tpu.matmul %192, %139, %cst_70 {dimension_numbers = #tpu.dot_dimension_numbers<[1], [0], [0], [1], [0, 0, 1, 1], [], []>} : vector<8x8xf32>, vector<8x32xf32>, vector<8x32xf32> -> vector<8x32xf32>
    %cst_71 = arith.constant dense<0.000000e+00> : vector<8x32xf32>
    %194 = tpu.matmul %183, %140, %cst_71 {dimension_numbers = #tpu.dot_dimension_numbers<[1], [0], [0], [1], [0, 0, 1, 1], [], []>} : vector<8x8xf32>, vector<8x32xf32>, vector<8x32xf32> -> vector<8x32xf32>
    %195 = arith.addf %193, %194 : vector<8x32xf32>
    %196 = vector.broadcast %141 : vector<1x32xf32> to vector<8x32xf32>
    %197 = arith.addf %195, %196 : vector<8x32xf32>
    %198 = vector.extract_strided_slice %197 {offsets = [0, 0], sizes = [8, 8], strides = [1, 1]} : vector<8x32xf32> to vector<8x8xf32>
    %199 = arith.negf %198 : vector<8x8xf32>
    %200 = math.exp %199 : vector<8x8xf32>
    %cst_72 = arith.constant 1.000000e+00 : f32
    %201 = vector.broadcast %cst_72 : f32 to vector<8x8xf32>
    %202 = arith.addf %201, %200 : vector<8x8xf32>
    %203 = arith.divf %201, %202 : vector<8x8xf32>
    %204 = vector.extract_strided_slice %197 {offsets = [0, 8], sizes = [8, 8], strides = [1, 1]} : vector<8x32xf32> to vector<8x8xf32>
    %205 = arith.negf %204 : vector<8x8xf32>
    %206 = math.exp %205 : vector<8x8xf32>
    %cst_73 = arith.constant 1.000000e+00 : f32
    %207 = vector.broadcast %cst_73 : f32 to vector<8x8xf32>
    %208 = arith.addf %207, %206 : vector<8x8xf32>
    %209 = arith.divf %207, %208 : vector<8x8xf32>
    %210 = vector.extract_strided_slice %197 {offsets = [0, 16], sizes = [8, 8], strides = [1, 1]} : vector<8x32xf32> to vector<8x8xf32>
    %211 = math.tanh %210 : vector<8x8xf32>
    %212 = vector.extract_strided_slice %197 {offsets = [0, 24], sizes = [8, 8], strides = [1, 1]} : vector<8x32xf32> to vector<8x8xf32>
    %213 = arith.negf %212 : vector<8x8xf32>
    %214 = math.exp %213 : vector<8x8xf32>
    %cst_74 = arith.constant 1.000000e+00 : f32
    %215 = vector.broadcast %cst_74 : f32 to vector<8x8xf32>
    %216 = arith.addf %215, %214 : vector<8x8xf32>
    %217 = arith.divf %215, %216 : vector<8x8xf32>
    %218 = arith.mulf %209, %190 : vector<8x8xf32>
    %219 = arith.mulf %203, %211 : vector<8x8xf32>
    %220 = arith.addf %218, %219 : vector<8x8xf32>
    %221 = math.tanh %220 : vector<8x8xf32>
    %222 = arith.mulf %217, %221 : vector<8x8xf32>
    %223 = vector.extract_strided_slice %1 {offsets = [0, 1], sizes = [8, 1], strides = [1, 1]} : vector<8x2xf32> to vector<8x1xf32>
    %224 = vector.broadcast %223 : vector<8x1xf32> to vector<8x8xf32>
    %225 = arith.mulf %224, %222 : vector<8x8xf32>
    %cst_75 = arith.constant 1.000000e+00 : f32
    %226 = vector.broadcast %cst_75 : f32 to vector<8x1xf32>
    %227 = arith.subf %226, %223 : vector<8x1xf32>
    %228 = vector.broadcast %227 : vector<8x1xf32> to vector<8x8xf32>
    %229 = arith.mulf %228, %183 : vector<8x8xf32>
    %230 = arith.addf %225, %229 : vector<8x8xf32>
    %c104 = arith.constant 104 : index
    %c0_76 = arith.constant 0 : index
    %231 = vector.load %arg1[%c104, %c0_76] : memref<128x32xf32, #tpu.memory_space<vmem>>, vector<8x3xf32>
    %c112 = arith.constant 112 : index
    %c0_77 = arith.constant 0 : index
    %232 = vector.load %arg1[%c112, %c0_77] : memref<128x32xf32, #tpu.memory_space<vmem>>, vector<8x3xf32>
    %c120 = arith.constant 120 : index
    %c0_78 = arith.constant 0 : index
    %233 = vector.load %arg1[%c120, %c0_78] : memref<128x32xf32, #tpu.memory_space<vmem>>, vector<1x3xf32>
    %cst_79 = arith.constant dense<0.000000e+00> : vector<8x3xf32>
    %234 = tpu.matmul %138, %231, %cst_79 {dimension_numbers = #tpu.dot_dimension_numbers<[1], [0], [0], [1], [0, 0, 1, 1], [], []>} : vector<8x8xf32>, vector<8x3xf32>, vector<8x3xf32> -> vector<8x3xf32>
    %cst_80 = arith.constant dense<0.000000e+00> : vector<8x3xf32>
    %235 = tpu.matmul %230, %232, %cst_80 {dimension_numbers = #tpu.dot_dimension_numbers<[1], [0], [0], [1], [0, 0, 1, 1], [], []>} : vector<8x8xf32>, vector<8x3xf32>, vector<8x3xf32> -> vector<8x3xf32>
    %236 = arith.addf %234, %235 : vector<8x3xf32>
    %237 = vector.broadcast %233 : vector<1x3xf32> to vector<8x3xf32>
    %238 = arith.addf %236, %237 : vector<8x3xf32>
    %cst_81 = arith.constant 0.000000e+00 : f32
    %239 = vector.broadcast %cst_81 : f32 to vector<8x3xf32>
    %240 = arith.maximumf %238, %239 : vector<8x3xf32>
    %cst_82 = arith.constant dense<0.000000e+00> : vector<8x3xf32>
    %241 = tpu.matmul %4, %240, %cst_82 {dimension_numbers = #tpu.dot_dimension_numbers<[1], [0], [0], [1], [0, 0, 1, 1], [], []>} : vector<8x8xf32>, vector<8x3xf32>, vector<8x3xf32> -> vector<8x3xf32>
    %c0_83 = arith.constant 0 : index
    %c0_84 = arith.constant 0 : index
    %242 = vector.load %arg2[%c0_83, %c0_84] : memref<8x3xf32, #tpu.memory_space<vmem>>, vector<8x3xf32>
    tpu.vector_store %arg2[%c0_83, %c0_84], %241 {strides = array<i32>} : memref<8x3xf32, #tpu.memory_space<vmem>>, vector<8x3xf32>,
    return
  }
}

</mosaic_0001>

<bundles_post_ra>
// kernel: tpu_custom_call.1
= control target key start
LH: loop header
LB: loop body
LE: loop exit
PB: predicated region body
PF: predicated region fallthrough
CT: control target
= control target key end

     0   :  { %vm20_vm0 = vcmask 64512   ;;  %vm98_vm1 = vcmask 1043456   ;;  %v1932_v0 = vmov 0.0   ;;  %vm1933_vm2 = vmmov 0   ;;  %s1935_s21 = smov 120   ;;  %s1936_s22 = smov 4   ;;  %s2181_s0 = inlined_call_operand.vmem [shape: f32[56,8], index: 0, kind: input, shape index: {}]   ;;  %s2182_s1 = inlined_call_operand.vmem [shape: f32[128,32], index: 1, kind: input, shape index: {}]   ;;  %s2183_s2 = inlined_call_operand.vmem [shape: f32[8,3], index: 2, kind: output, shape index: {}]  }
   0x1   :  { %1782 = vmatprep.subr.mxu0 %v1932_v0  ;;  %v1962_v1 = vld [vmem:[%s2181_s0] sm:$0xff]  ;;  %1784 = vmatprep.mubr.msk.f32.mxu0 %vm1933_vm2, %v1932_v0  ;;  %v1969_v2 = vld [vmem:[%s2181_s0 + $0x28] sm:$0xff]  ;;  %vm94_vm3 = vcmask 31744   ;;  %v1934_v10 = vmov 0   ;;  %v1711_v12 = vld [vmem:[%s2182_s1 + $0x10] ss:$0 sm:$0xff] }
   0x2   :  { %v17_v3 = vld [vmem:[%s2182_s1 + $0x8] sm:$0xf]  ;;  %1783 = vmatpush3.msra.mxu0 %v1962_v1  ;;  %1787 = vmatprep.subr.mxu1 %v1932_v0  ;;  %v16_v4 = vld [vmem:[%s2182_s1] sm:$0xf]  ;;  %v2017_v24 = vld [vmem:[%s2181_s0 + $0x30] sm:$0xff]  ;;  %s1937_s25 = smov 8  }
   0x3   :  { %1785 = vmatmul.mubr.msk.f32.vlgmr.msra.gmra.mrb[0].mxu0 %vm20_vm0, %v1969_v2  ;;  %1788 = vmatpush3.msk.msra.mxu1 %vm98_vm1, %v17_v3  ;;  %v2003_v9 = vld [vmem:[%s2181_s0 + $0x8] sm:$0xff]  ;;  %s1938_s26 = smov 116   ;;  %v1939_v45 = vmov 1   ;;  %v551_v58 = vld [vmem:[%s2182_s1 + $0x18] sm:$0xf]  ;;  %s1941_s27 = smov 16  }
   0x4   :  { %1789 = vmatprep.mubr.msk.f32.mxu1 %vm1933_vm2, %v1932_v0  ;;  %1792 = vmatprep.subr.mxu0 %v1932_v0  ;;  %v283_v11 = vsub.f32 1.0, %v2003_v9  ;;  %v552_v59 = vld [vmem:[%s2182_s1 + $0x20] sm:$0xf]  ;;  %s1942_s28 = smov 104   ;;  %vm1701_vm5 = vcmask 23552  }
   0x5   :  { %1790 = vmatmul.mubr.f32.vlgmr.msra.gmra.mrb[0].mxu1 %v1932_v0  ;;  %1794 = vmatprep.mubr.msk.f32.mxu0 %vm1933_vm2, %v1932_v0 }
   0x6   :  { %1797 = vmatprep.subr.mxu1 %v1932_v0  ;;  %1799 = vmatprep.mubr.msk.f32.mxu1 %vm1933_vm2, %v1932_v0 }
   0x7   :  { %1798 = vmatpush3.msra.mxu1 %v1962_v1  ;;  %1793 = vmatpush3.msk.msra.mxu0 %vm98_vm1, %v16_v4 }
   0x8   :  { %1807 = vmatprep.subr.mxu1 %v1932_v0  ;;  %1802 = vmatprep.subr.mxu0 %v1932_v0 }
   0x9   :  { %1893 = vset.pattern.permute.xlu1 %v1934_v10  ;;  %1800 = vmatmul.mubr.msk.f32.vlgmr.msra.gmra.mrb[2].mxu1 %vm20_vm0, %v2017_v24  ;;  %v1723_v10 = vld [vmem:[%s2182_s1 + $0x28] ss:$0 sm:$0xff] }
   0xa   :  { %279 = vperm.xlu1 %1893, %v2003_v9   ;;  %1808 = vmatpush3.msk.msra.mxu1 %vm98_vm1, %v16_v4 }
   0xb   :  { %1809 = vmatprep.mubr.msk.f32.mxu1 %vm1933_vm2, %v1932_v0  ;;  %1817 = vmatprep.subr.mxu1 %v1932_v0 }
   0xc   :  { %1894 = vset.pattern.permute.xlu0 %v1939_v45 }
   0xe   :  { %286 = vperm.xlu1 %1893, %v283_v11  }
  0x12   :  { %1895 = vset.pattern.permute.xlu1 %v1939_v45 }
  0x89   :  { %v2029_v31 = vpop.permute.xlu1 %279 }
  0x8d   :  { %v287_v32 = vpop.permute.xlu1 %286 }
  0x8e   :  { %v2031_v35 = vmul.f32 0.0, %v287_v32 }
  0xd6   :  { %v90_v5 = vpop.f32.mrb[0].mxu0 }
  0xd7   :  { %v1786_v6 = vpop.f32.mrb[1].mxu0  ;;  %1795 = vmatmul.mubr.msk.f32.vlgmr.msra.gmra.mrb[2].mxu0 %vm94_vm3, %v90_v5 }
  0xd8   :  { %v168_v7 = vpop.f32.mrb[0].mxu1  ;;  %1803 = vmatpush3.msk.msra.mxu0 %vm98_vm1, %v17_v3  ;;  %1804 = vmatprep.mubr.msk.f32.mxu0 %vm1933_vm2, %v1932_v0 }
  0xd9   :  { %v1791_v8 = vpop.f32.mrb[1].mxu1  ;;  %1812 = vmatprep.subr.mxu0 %v1932_v0 }
  0xdc   :  { %v363_v29 = vpop.f32.mrb[2].mxu1 }
  0xdd   :  { %v1801_v30 = vpop.f32.mrb[3].mxu1  ;;  %1810 = vmatmul.mubr.msk.f32.vlgmr.msra.gmra.mrb[4].mxu1 %vm94_vm3, %v363_v29 }
  0xde   :  { %1819 = vmatprep.mubr.msk.f32.mxu1 %vm1933_vm2, %v1932_v0  ;;  %1818 = vmatpush3.msk.msra.mxu1 %vm98_vm1, %v551_v58 }
  0xdf   :  { %1827 = vmatprep.subr.mxu1 %v1932_v0 }
  0xe1   :  { %1820 = vmatmul.mubr.msk.f32.vlgmr.msra.gmra.mrb[6].mxu1 %vm94_vm3, %v1962_v1 }
  0xe2   :  { %1829 = vmatprep.mubr.msk.f32.mxu1 %vm1933_vm2, %v1932_v0 }
 0x1aa   :  { %v244_v13 = vpop.f32.mrb[2].mxu0 }
 0x1ab   :  { %v245_v14 = vadd.f32 %v244_v13, %v168_v7  ;;  %v1796_v15 = vpop.f32.mrb[3].mxu0 }
 0x1ad   :  { %v252_v16 = vadd.f32 %v1711_v12, %v245_v14 }
 0x1af   :  { %1896 = vtanh.f32 %v252_v16  ;;  %v1712_v18 = vmul.f32 -1.442695, %v252_v16  ;;  %v1724_v16 = vld [vmem:[%s2182_s1 + $0x38] ss:$0 sm:$0xff] }
 0x1b0   :  { %v511_v39 = vpop.f32.mrb[4].mxu1 }
 0x1b1   :  { %1898 = vpow2.f32 %v1712_v18  ;;  %v1811_v40 = vpop.f32.mrb[5].mxu1  ;;  %v1726_v18 = vld [vmem:[%s2182_s1 + $0x40] ss:$0 sm:$0xff] }
 0x1b4   :  { %v704_v6 = vpop.f32.mrb[6].mxu1 }
 0x1b5   :  { %v1821_v7 = vpop.f32.mrb[7].mxu1 }
 0x1b9   :  { %v1897_v17 = vpop.eup %1896 }
 0x1ba   :  { %262 = vrot.lane.b32.xlu0 %v1897_v17, %s1935_s21 }
 0x1bb   :  { %v1899_v19 = vpop.eup %1898 }
 0x1bc   :  { %v256_v20 = vadd.f32 1.0, %v1899_v19 }
 0x1be   :  { %1900 = vrcp.f32 %v256_v20 }
 0x1c8   :  { %v1901_v21 = vpop.eup %1900 }
 0x1c9   :  { %v260_v25 = vmul.f32 0.0, %v1901_v21 }
 0x22c   :  { %v263_v22 = vpop.permute.xlu0 %262 }
 0x22d   :  { %v265_v23 = vmul.f32 %v1901_v21, %v263_v22 }
 0x22f   :  { %267 = vrot.lane.b32.xlu0 %v265_v23, %s1936_s22 }
 0x2a1   :  { %v268_v26 = vpop.permute.xlu0 %267 }
 0x2a2   :  { %v270_v27 = vadd.f32 %v268_v26, %v260_v25  ;;  %v879_v25 = vlaneseq }
 0x2a4   :  { %1902 = vtanh.f32 %v270_v27  ;;  %v291_v53 = vmul.f32 %v2029_v31, %v270_v27  ;;  %v880_v26 = vshrl.u32 %v879_v25, 7 }
 0x2a6   :  { %v292_v54 = vadd.f32 %v291_v53, %v2031_v35  ;;  %v881_v27 = vsub.s32 0, %v880_v26 }
 0x2ae   :  { %v1903_v28 = vpop.eup %1902 }
 0x2af   :  { %273 = vrot.lane.b32.xlu0 %v1903_v28, %s1937_s25 }
 0x321   :  { %v274_v33 = vpop.permute.xlu0 %273 }
 0x322   :  { %v276_v34 = vmul.f32 %v1901_v21, %v274_v33  ;;  %v802_v21 = vld [vmem:[%s2182_s1 + $0x48] sm:$0x1]  ;;  %v13_v33 = vld [vmem:[%s2181_s0 + $0x10] sm:$0xff] }
 0x324   :  { %v282_v36 = vmul.f32 %v2029_v31, %v276_v34 }
 0x326   :  { %v290_v37 = vadd.f32 %v2031_v35, %v282_v36 }
 0x328   :  { %368 = vrot.lane.b32.xlu1 %v290_v37, %s1938_s26 }
 0x39a   :  { %v369_v38 = vpop.permute.xlu1 %368 }
 0x39b   :  { %1805 = vmatmul.mubr.msk.f32.vlgmr.msra.gmra.mrb[4].mxu0 %vm94_vm3, %v369_v38 }
 0x39c   :  { %1814 = vmatprep.mubr.msk.f32.mxu0 %vm1933_vm2, %v1932_v0  ;;  %1813 = vmatpush3.msk.msra.mxu0 %vm98_vm1, %v552_v59 }
 0x39d   :  { %1822 = vmatprep.subr.mxu0 %v1932_v0 }
 0x46e   :  { %v438_v41 = vpop.f32.mrb[4].mxu0 }
 0x46f   :  { %v512_v42 = vadd.f32 %v511_v39, %v438_v41  ;;  %v1806_v43 = vpop.f32.mrb[5].mxu0 }
 0x471   :  { %v515_v44 = vadd.f32 %v1711_v12, %v512_v42 }
 0x473   :  { %1904 = vtanh.f32 %v515_v44  ;;  %v1718_v47 = vmul.f32 -1.442695, %v515_v44 }
 0x475   :  { %1906 = vpow2.f32 %v1718_v47 }
 0x47d   :  { %v1905_v46 = vpop.eup %1904 }
 0x47e   :  { %525 = vrot.lane.b32.xlu0 %v1905_v46, %s1935_s21 }
 0x47f   :  { %v1907_v48 = vpop.eup %1906 }
 0x480   :  { %v519_v49 = vadd.f32 1.0, %v1907_v48 }
 0x482   :  { %541 = vperm.xlu0 %1894, %v2003_v9   ;;  %1908 = vrcp.f32 %v519_v49  ;;  %v714_v9 = vld [vmem:[%s2182_s1 + $0x30] sm:$0xff] }
 0x48c   :  { %v1909_v50 = vpop.eup %1908 }
 0x48d   :  { %v523_v55 = vmul.f32 %v1909_v50, %v292_v54 }
 0x4f0   :  { %v526_v51 = vpop.permute.xlu0 %525 }
 0x4f1   :  { %v528_v52 = vmul.f32 %v1909_v50, %v526_v51  ;;  %v975_v51 = vld [vmem:[%s2182_s1 + $0x58] sm:$0xff] }
 0x4f3   :  { %530 = vrot.lane.b32.xlu1 %v528_v52, %s1936_s22 }
 0x4f7   :  { %546 = vperm.xlu1 %1895, %v283_v11  }
 0x501   :  { %v2063_v63 = vpop.permute.xlu0 %541 }
 0x565   :  { %v531_v56 = vpop.permute.xlu1 %530 }
 0x566   :  { %v533_v57 = vadd.f32 %v531_v56, %v523_v55  ;;  %v974_v56 = vld [vmem:[%s2182_s1 + $0x50] sm:$0xff] }
 0x568   :  { %1910 = vtanh.f32 %v533_v57 }
 0x572   :  { %v1911_v60 = vpop.eup %1910 }
 0x573   :  { %536 = vrot.lane.b32.xlu1 %v1911_v60, %s1937_s25  ;;  %v1732_v60 = vld [vmem:[%s2182_s1 + $0x60] ss:$0 sm:$0xff] }
 0x576   :  { %v2061_v61 = vpop.permute.xlu1 %546 }
 0x577   :  { %v549_v4 = vmul.f32 %v2061_v61, %v290_v37  ;;  %v14_v37 = vld [vmem:[%s2181_s0 + $0x18] sm:$0xff] }
 0x5e5   :  { %v537_v62 = vpop.permute.xlu1 %536 }
 0x5e6   :  { %v539_v3 = vmul.f32 %v1909_v50, %v537_v62 }
 0x5e8   :  { %v544_v1 = vmul.f32 %v2063_v63, %v539_v3 }
 0x5ea   :  { %v550_v5 = vadd.f32 %v549_v4, %v544_v1 }
 0x5ec   :  { %555 = vrot.lane.b32.xlu0 %v550_v5, %s1938_s26  ;;  %s1940_s26 = smov 112  }
 0x65e   :  { %v556_v8 = vpop.permute.xlu0 %555 }
 0x65f   :  { %1815 = vmatmul.mubr.msk.f32.vlgmr.msra.gmra.mrb[6].mxu0 %vm94_vm3, %v556_v8 }
 0x660   :  { %1824 = vmatprep.mubr.msk.f32.mxu0 %vm1933_vm2, %v1932_v0  ;;  %1823 = vmatpush3.msra.mxu0 %v714_v9 }
 0x661   :  { %1832 = vmatprep.subr.mxu0 %v1932_v0 }
 0x732   :  { %v628_v11 = vpop.f32.mrb[6].mxu0 }
 0x733   :  { %v705_v12 = vadd.f32 %v704_v6, %v628_v11  ;;  %v1816_v13 = vpop.f32.mrb[7].mxu0 }
 0x735   :  { %v712_v14 = vadd.f32 %v1723_v10, %v705_v12 }
 0x737   :  { %v713_v15 = vmax.f32 %v712_v14, 0.0 }
 0x739   :  { %1825 = vmatmul.mubr.msk.f32.vlgmr.msra.gmra.mrb[8].mxu0 %vm20_vm0, %v713_v15 }
 0x73a   :  { %1834 = vmatprep.mubr.msk.f32.mxu0 %vm1933_vm2, %v1932_v0 }
 0x80c   :  { %v789_v17 = vpop.f32.mrb[8].mxu0 }
 0x80d   :  { %v790_v19 = vadd.f32 %v1724_v16, %v789_v17  ;;  %v1826_v20 = vpop.f32.mrb[9].mxu0 }
 0x80f   :  { %1828 = vmatpush3.xpose.msk.msra.mxu1 %vm20_vm0, %v790_v19  ;;  %1833 = vmatpush3.msra.mxu0 %v790_v19  ;;  %v798_v22 = vmul.f32 %v1726_v18, %v790_v19 }
 0x810   :  { %1842 = vmatprep.subr.mxu0 %v1932_v0  ;;  %1837 = vmatprep.subr.mxu1 %v1932_v0 }
 0x811   :  { %v799_v23 = vsel %vm20_vm0, %v798_v22, 0.0 }
 0x812   :  { %1830 = vmatmul.mubr.msk.f32.vlgmr.msra.gmra.mrb[8].mxu1 %vm20_vm0, %v802_v21  ;;  %800 = vadd.xlane.f32.xlu1 %v799_v23 }
 0x813   :  { %1839 = vmatprep.mubr.msk.f32.mxu1 %vm1933_vm2, %v1932_v0 }
 0x89f   :  { %v801_v32 = vpop.xlane.xlu1 %800 }
 0x8e5   :  { %v875_v28 = vpop.f32.mrb[8].mxu1 }
 0x8e6   :  { %v882_v29 = vrot.slane %v875_v28, %v881_v27  ;;  %v1831_v30 = vpop.f32.mrb[9].mxu1 }
 0x8e8   :  { %v883_v34 = vadd.f32 %v882_v29, %v801_v32 }
 0x8ea   :  { %v884_v36 = vadd.f32 %v883_v34, %v13_v33 }
 0x8ec   :  { %vm885_vm4 = vcmp.gt.f32.partialorder %v884_v36, 0.0  ;;  %v886_v38 = vmul.f32 0.2, %v884_v36 }
 0x8ee   :  { %v887_v39 = vsel %vm885_vm4, %v884_v36, %v886_v38 }
 0x8ef   :  { %v888_v40 = vadd.f32 %v887_v39, %v14_v37 }
 0x8f1   :  { %v889_v41 = vsel %vm20_vm0, %v888_v40, -inf }
 0x8f2   :  { %890 = vmax.xlane.f32.xlu0 %v889_v41 }
 0x97f   :  { %v891_v42 = vpop.xlane.xlu0 %890 }
 0x980   :  { %v892_v43 = vsub.f32 %v888_v40, %v891_v42 }
 0x982   :  { %v893_v44 = vmul.f32 1.442695, %v892_v43 }
 0x984   :  { %1912 = vpow2.f32 %v893_v44  ;;  %v1472_v44 = vld [vmem:[%s2182_s1 + $0x70] sm:$0xff] }
 0x98e   :  { %v1913_v45 = vpop.eup %1912 }
 0x98f   :  { %v895_v46 = vsel %vm20_vm0, %v1913_v45, 0.0 }
 0x990   :  { %896 = vadd.xlane.f32.xlu0 %v895_v46 }
 0xa1d   :  { %v897_v47 = vpop.xlane.xlu0 %896 }
 0xa1e   :  { %v898_v48 = vadd.f32 1e-09, %v897_v47 }
 0xa20   :  { %1914 = vrcp.f32 %v898_v48 }
 0xa2a   :  { %v1915_v49 = vpop.eup %1914 }
 0xa2b   :  { %v900_v50 = vmul.f32 %v1915_v49, %v1913_v45 }
 0xa2d   :  { %1835 = vmatmul.mubr.msk.f32.vlgmr.msra.gmra.mrb[10].mxu0 %vm20_vm0, %v900_v50  ;;  %v1740_v50 = vld [vmem:[%s2182_s1 + $0x78] ss:$0 sm:$0xff] }
 0xa2e   :  { %1843 = vmatpush3.msra.mxu0 %v975_v51  ;;  %1844 = vmatprep.mubr.msk.f32.mxu0 %vm1933_vm2, %v1932_v0 }
 0xa2f   :  { %1852 = vmatprep.subr.mxu0 %v1932_v0 }
 0xa31   :  { %1845 = vmatmul.mubr.f32.vlgmr.msra.gmra.mrb[12].mxu0 %v1932_v0 }
 0xa32   :  { %1854 = vmatprep.mubr.msk.f32.mxu0 %vm1933_vm2, %v1932_v0 }
 0xb00   :  { %v970_v52 = vpop.f32.mrb[10].mxu0 }
 0xb01   :  { %v1836_v53 = vpop.f32.mrb[11].mxu0  ;;  %1838 = vmatpush3.msra.mxu1 %v970_v52  ;;  %1853 = vmatpush3.msra.mxu0 %v970_v52 }
 0xb02   :  { %1840 = vmatmul.mubr.msk.f32.vlgmr.msra.gmra.mrb[10].mxu1 %vm20_vm0, %v1969_v2  ;;  %1855 = vmatmul.mubr.msk.f32.vlgmr.msra.gmra.mrb[14].mxu0 %vm20_vm0, %v2017_v24  ;;  %v1471_v2 = vld [vmem:[%s2182_s1 + $0x68] sm:$0xff] }
 0xb03   :  { %1847 = vmatprep.subr.mxu1 %v1932_v0  ;;  %1862 = vmatprep.subr.mxu0 %v1932_v0 }
 0xb04   :  { %v1115_v54 = vpop.f32.mrb[12].mxu0  ;;  %1849 = vmatprep.mubr.msk.f32.mxu1 %vm1933_vm2, %v1932_v0  ;;  %1864 = vmatprep.mubr.msk.f32.mxu0 %vm1933_vm2, %v1932_v0 }
 0xb05   :  { %v1846_v55 = vpop.f32.mrb[13].mxu0  ;;  %1848 = vmatpush3.msra.mxu1 %v974_v56  ;;  %1863 = vmatpush3.msra.mxu0 %v974_v56 }
 0xb06   :  { %1872 = vmatprep.subr.mxu0 %v1932_v0  ;;  %1857 = vmatprep.subr.mxu1 %v1932_v0 }
 0xbd5   :  { %v1043_v24 = vpop.f32.mrb[10].mxu1  ;;  %v1291_v57 = vpop.f32.mrb[14].mxu0 }
 0xbd6   :  { %v1841_v58 = vpop.f32.mrb[11].mxu1  ;;  %1850 = vmatmul.mubr.msk.f32.vlgmr.msra.gmra.mrb[12].mxu1 %vm20_vm0, %v1043_v24  ;;  %1865 = vmatmul.mubr.msk.f32.vlgmr.msra.gmra.mrb[16].mxu0 %vm20_vm0, %v1291_v57  ;;  %v1856_v59 = vpop.f32.mrb[15].mxu0 }
 0xbd7   :  { %1873 = vmatpush3.msra.mxu0 %v1471_v2  ;;  %1874 = vmatprep.mubr.msk.f32.mxu0 %vm1933_vm2, %v1932_v0 }
 0xbd8   :  { %1858 = vmatpush3.msra.mxu1 %v975_v51  ;;  %1859 = vmatprep.mubr.msk.f32.mxu1 %vm1933_vm2, %v1932_v0 }
 0xbd9   :  { %1867 = vmatprep.subr.mxu1 %v1932_v0 }
 0xbda   :  { %1875 = vmatmul.mubr.msk.f32.vlgmr.msra.gmra.mrb[18].mxu0 %vm20_vm0, %v970_v52 }
 0xca9   :  { %v1188_v62 = vpop.f32.mrb[12].mxu1  ;;  %v1439_v3 = vpop.f32.mrb[16].mxu0 }
 0xcaa   :  { %v1189_v4 = vadd.f32 %v1188_v62, %v1115_v54  ;;  %v1851_v1 = vpop.f32.mrb[13].mxu1  ;;  %v1866_v5 = vpop.f32.mrb[17].mxu0 }
 0xcac   :  { %v1196_v6 = vadd.f32 %v1732_v60, %v1189_v4 }
 0xcad   :  { %v2144_v7 = vpop.f32.mrb[18].mxu0 }
 0xcae   :  { %1916 = vtanh.f32 %v1196_v6  ;;  %v1876_v8 = vpop.f32.mrb[19].mxu0  ;;  %v1733_v10 = vmul.f32 -1.442695, %v1196_v6 }
 0xcb0   :  { %1918 = vpow2.f32 %v1733_v10 }
 0xcb8   :  { %v1917_v9 = vpop.eup %1916 }
 0xcb9   :  { %1206 = vrot.lane.b32.xlu1 %v1917_v9, %s1940_s26 }
 0xcba   :  { %v1919_v11 = vpop.eup %1918 }
 0xcbb   :  { %v1200_v12 = vadd.f32 1.0, %v1919_v11 }
 0xcbd   :  { %1920 = vrcp.f32 %v1200_v12 }
 0xcc7   :  { %v1921_v13 = vpop.eup %1920 }
 0xcc8   :  { %v1204_v16 = vmul.f32 0.0, %v1921_v13 }
 0xd2b   :  { %v1207_v14 = vpop.permute.xlu1 %1206 }
 0xd2c   :  { %v1209_v15 = vmul.f32 %v1921_v13, %v1207_v14 }
 0xd2e   :  { %1211 = vrot.lane.b32.xlu0 %v1209_v15, %s1937_s25 }
 0xda0   :  { %v1212_v17 = vpop.permute.xlu0 %1211 }
 0xda1   :  { %v1214_v18 = vadd.f32 %v1212_v17, %v1204_v16 }
 0xda3   :  { %1922 = vtanh.f32 %v1214_v18  ;;  %v1223_v39 = vmul.f32 %v1214_v18, %v2029_v31 }
 0xda5   :  { %v1224_v40 = vadd.f32 %v1223_v39, %v2031_v35 }
 0xdad   :  { %v1923_v19 = vpop.eup %1922 }
 0xdae   :  { %1217 = vrot.lane.b32.xlu1 %v1923_v19, %s1941_s27 }
 0xe20   :  { %v1218_v20 = vpop.permute.xlu1 %1217 }
 0xe21   :  { %v1220_v21 = vmul.f32 %v1921_v13, %v1218_v20 }
 0xe23   :  { %v1221_v22 = vmul.f32 %v1220_v21, %v2029_v31 }
 0xe25   :  { %v1222_v23 = vadd.f32 %v1221_v22, %v2031_v35 }
 0xe27   :  { %1296 = vrot.lane.b32.xlu1 %v1222_v23, %s1942_s28  ;;  %v1469_v35 = vmul.f32 %v1222_v23, %v2061_v61  ;;  %v15_v61 = vld [vmem:[%s2181_s0 + $0x20] sm:$0xff] }
 0xe99   :  { %v1297_v25 = vpop.permute.xlu1 %1296 }
 0xe9a   :  { %1860 = vmatmul.mubr.msk.f32.vlgmr.msra.gmra.mrb[14].mxu1 %vm20_vm0, %v1297_v25 }
 0xe9b   :  { %1869 = vmatprep.mubr.msk.f32.mxu1 %vm1933_vm2, %v1932_v0  ;;  %1868 = vmatpush3.msra.mxu1 %v1472_v44 }
 0xe9c   :  { %1877 = vmatprep.subr.mxu1 %v1932_v0 }
 0xf6d   :  { %v1366_v26 = vpop.f32.mrb[14].mxu1 }
 0xf6e   :  { %v1440_v27 = vadd.f32 %v1439_v3, %v1366_v26  ;;  %v1861_v28 = vpop.f32.mrb[15].mxu1 }
 0xf70   :  { %v1443_v29 = vadd.f32 %v1732_v60, %v1440_v27 }
 0xf72   :  { %1924 = vtanh.f32 %v1443_v29  ;;  %v1737_v32 = vmul.f32 -1.442695, %v1443_v29 }
 0xf74   :  { %1926 = vpow2.f32 %v1737_v32 }
 0xf7c   :  { %v1925_v30 = vpop.eup %1924 }
 0xf7d   :  { %1453 = vrot.lane.b32.xlu0 %v1925_v30, %s1940_s26 }
 0xf7e   :  { %v1927_v33 = vpop.eup %1926 }
 0xf7f   :  { %v1447_v34 = vadd.f32 1.0, %v1927_v33 }
 0xf81   :  { %1928 = vrcp.f32 %v1447_v34 }
 0xf8b   :  { %v1929_v36 = vpop.eup %1928 }
 0xf8c   :  { %v1451_v41 = vmul.f32 %v1929_v36, %v1224_v40 }
 0xfef   :  { %v1454_v37 = vpop.permute.xlu0 %1453 }
 0xff0   :  { %v1456_v38 = vmul.f32 %v1929_v36, %v1454_v37 }
 0xff2   :  { %1458 = vrot.lane.b32.xlu1 %v1456_v38, %s1937_s25 }
0x1064   :  { %v1459_v42 = vpop.permute.xlu1 %1458 }
0x1065   :  { %v1461_v43 = vadd.f32 %v1459_v42, %v1451_v41 }
0x1067   :  { %1930 = vtanh.f32 %v1461_v43 }
0x1071   :  { %v1931_v45 = vpop.eup %1930 }
0x1072   :  { %1464 = vrot.lane.b32.xlu0 %v1931_v45, %s1941_s27 }
0x10e4   :  { %v1465_v46 = vpop.permute.xlu0 %1464 }
0x10e5   :  { %v1467_v47 = vmul.f32 %v1929_v36, %v1465_v46 }
0x10e7   :  { %v1468_v31 = vmul.f32 %v1467_v47, %v2063_v63 }
0x10e9   :  { %v1470_v48 = vadd.f32 %v1469_v35, %v1468_v31 }
0x10eb   :  { %1475 = vrot.lane.b32.xlu1 %v1470_v48, %s1942_s28 }
0x115d   :  { %v1476_v49 = vpop.permute.xlu1 %1475 }
0x115e   :  { %1870 = vmatmul.mubr.msk.f32.vlgmr.msra.gmra.mrb[16].mxu1 %vm20_vm0, %v1476_v49 }
0x115f   :  { %1879 = vmatprep.mubr.msk.f32.mxu1 %vm1933_vm2, %v1932_v0 }
0x1231   :  { %v1545_v51 = vpop.f32.mrb[16].mxu1 }
0x1232   :  { %v1619_v52 = vadd.f32 %v2144_v7, %v1545_v51  ;;  %v1871_v53 = vpop.f32.mrb[17].mxu1 }
0x1234   :  { %v1626_v63 = vadd.f32 %v1740_v50, %v1619_v52 }
0x1236   :  { %v1627_v54 = vmax.f32 %v1626_v63, 0.0 }
0x1238   :  { %1878 = vmatpush3.msra.mxu1 %v1627_v54 }
0x1239   :  { %1880 = vmatmul.mubr.msk.f32.vlgmr.msra.gmra.mrb[18].mxu1 %vm20_vm0, %v15_v61 }
0x130c   :  { %v1697_v55 = vpop.f32.mrb[18].mxu1 }
0x130d   :  { %1702 = vst.msk [vmem:[%s2183_s2] sm:$0xff] %vm1701_vm5, %v1697_v55  ;;  %v1881_v0 = vpop.f32.mrb[19].mxu1 }

</bundles_post_ra>
